<compile_context>
chip_gen: v6e
topology: v6e:2x2x1
jax: 0.10.0
libtpu: 0.0.40
codegen_flags: <defaults>
</compile_context>

<pallas_src>
import jax
import jax.numpy as jnp
from jax import lax
from jax.experimental import pallas as pl
from jax.experimental.pallas import tpu as pltpu

LEAKY_SLOPE = 0.01   # nn.LeakyReLU default negative_slope
BN_EPS = 1e-5        # nn.BatchNorm2d default eps


# ---------------- wrapper-side weight preprocessing (plain JAX, tiny) ----------------

def _fold_bn(gamma, beta, mean, var):
    scale = gamma * lax.rsqrt(var + BN_EPS)
    bias = beta - mean * scale
    return scale, bias


def _toeplitz_reflect_weights(w_hwio, bn_scale, W):
    """Fold the 3 horizontal taps, column reflect-padding and the BatchNorm scale of a
    3x3 conv into ONE K-concatenated slab of shape (3*W*Cin, W*Cout):

        out[r, w*Cout+co] = op[r, :] @ slab[:, w*Cout+co]

    where op[r] = [x_row(r-1) | x_row(r) | x_row(r+1)] (rows reflected at image edges)
    and each x_row is the (w, ci)-flattened lane-dense NHWC row.
    """
    kh, kw, Cin, Cout = w_hwio.shape
    w_s = w_hwio.astype(jnp.float32) * bn_scale.astype(jnp.float32).reshape(1, 1, 1, Cout)
    # source column for output column w and horizontal tap dx, with reflect padding folded
    src = jnp.arange(W)[None, :] + jnp.arange(kw)[:, None] - (kw // 2)      # (kw, W)
    src = jnp.abs(src)                                                       # reflect left
    src = jnp.where(src > W - 1, 2 * (W - 1) - src, src)                     # reflect right
    sel = (src[:, :, None] == jnp.arange(W)[None, None, :]).astype(jnp.float32)  # (kw,Wout,Wsrc)
    # slab[dy, s, ci, w, co] = sum_dx sel[dx, w, s] * w_s[dy, dx, ci, co]
    slab = jnp.einsum("xws,yxic->ysiwc", sel, w_s)           # (kh, Wsrc, Cin, Wout, Cout)
    return slab.reshape(kh * W * Cin, W * Cout)               # K-concatenated along dy


def _choose_images_per_step(N, H, min_rows=128, max_rows=256):
    """Images per grid step. Targets an MXU M dimension of min_rows..max_rows while
    preferring to keep >=2 grid steps (both v7x TensorCores busy); the f32 accumulator of
    a (256,128) tile is already 32 of 64 vregs, hence the max_rows cap."""
    divs = [b for b in range(1, N + 1) if N % b == 0 and b * H <= max_rows]
    if not divs:
        return 1
    for b in divs:                       # smallest divisor reaching min_rows keeps the
        if b * H >= min_rows:            # most parallel grid steps
            return b
    return divs[-1]                      # tiny problems: biggest block that fits the cap


# --------------------------------- Pallas kernel --------------------------------------

def _make_fused_kernel(B, H, compute_dtype):
    BH = B * H

    def _rowshift_cat(x):
        """x: (B*H, K) lane-dense slab of B stacked images (H rows each).
        Returns (B*H, 3*K) whose column groups are [row-1 | row | row+1], with per-image
        reflect padding of 1 at the top/bottom rows (row -1 -> 1, row H -> H-2)."""
        up0 = jnp.concatenate([x[-1:, :], x[:-1, :]], axis=0)     # up0[r]  = x[r-1]
        dn0 = jnp.concatenate([x[1:, :], x[:1, :]], axis=0)       # dn0[r]  = x[r+1]
        row = lax.broadcasted_iota(jnp.int32, (BH, 1), 0) % H     # row within its image
        up = jnp.where(row == 0, dn0, up0)                        # top reflect  (-1 -> 1)
        dn = jnp.where(row == H - 1, up0, dn0)                    # bottom reflect (H -> H-2)
        return jnp.concatenate([up, x, dn], axis=1)

    def kernel(x_ref, w1_ref, b1_ref, w2_ref, b2_ref, out_ref):
        # ---- layer 1: single MXU dot, K = 3*W*Cin, BN scale folded into the slab ----
        op1 = _rowshift_cat(x_ref[...])                            # (B*H, 3*W*Cin) bf16
        y1 = jnp.dot(op1, w1_ref[...], preferred_element_type=jnp.float32)
        y1 = y1 + b1_ref[...]                                      # folded BN bias, f32
        y1 = jnp.where(y1 > 0, y1, LEAKY_SLOPE * y1)               # LeakyReLU
        # TODO(synk): Dropout2d(0.3) is identity in eval mode; training-mode channel
        # dropout and batch-statistics BatchNorm are not reproduced here.

        # ---- layer 2: bf16 on-chip intermediate (never hits scratch/HBM), K = 3*W*C1 ----
        op2 = _rowshift_cat(y1.astype(compute_dtype))              # (B*H, 3*W*C1) bf16
        y2 = jnp.dot(op2, w2_ref[...], preferred_element_type=jnp.float32)
        y2 = y2 + b2_ref[...]
        y2 = jnp.where(y2 > 0, y2, LEAKY_SLOPE * y2)
        out_ref[...] = y2.astype(out_ref.dtype)                    # lane-dense full-width store

    return kernel


# ------------------------------------ wrapper ------------------------------------------

def convolutional_block(x_nchw, params, compute_dtype=jnp.bfloat16):
    """Inference forward of ConvolutionalBlock. NCHW in / NCHW out (PyTorch convention)."""
    (w1, g1, be1, m1, v1), (w2, g2, be2, m2, v2) = params
    N, Cin, H, W = x_nchw.shape
    C1 = w1.shape[-1]
    C2 = w2.shape[-1]
    assert w1.shape[:3] == (3, 3, Cin) and w2.shape[:3] == (3, 3, C1)
    assert H >= 2 and W >= 2          # reflect pad of 1 needs >= 2 rows / cols
    # TODO(synk): the Toeplitz path targets lane-sized W*C (W*Cout == 128 here); for large
    # W*C switch to halo row-tiles with per-tap (tile, Cin)@(Cin, Cout) dots — that also
    # removes the ~W/3 redundant-MAC density waste that matters most on v5e's smaller MXU.

    B = _choose_images_per_step(N, H)                     # images per grid step
    BH = B * H

    # -- layout plumbing (plain JAX): NCHW -> lane-dense (N*H, W*Cin) slab. Row reflect
    #    padding is handled in-kernel; column reflect is folded into the Toeplitz weights.
    x_flat = jnp.transpose(x_nchw, (0, 2, 3, 1)).reshape(N * H, W * Cin).astype(compute_dtype)
    # TODO(synk): when chaining ConvolutionalBlocks, keep this lane-dense (N*H, W*C) layout
    # between blocks instead of transposing back to NCHW after every block.

    s1, bias1 = _fold_bn(g1, be1, m1, v1)
    s2, bias2 = _fold_bn(g2, be2, m2, v2)
    w1t = _toeplitz_reflect_weights(w1, s1, W).astype(compute_dtype)    # (3*W*Cin, W*C1)
    w2t = _toeplitz_reflect_weights(w2, s2, W).astype(compute_dtype)    # (3*W*C1, W*C2)
    b1t = jnp.tile(bias1, W).reshape(1, W * C1).astype(jnp.float32)
    b2t = jnp.tile(bias2, W).reshape(1, W * C2).astype(jnp.float32)

    # -- VMEM budget derived from the actual device (v7x: 64 MiB, v5e/v6e: 128 MiB) --
    isz = jnp.dtype(compute_dtype).itemsize
    osz = jnp.dtype(x_nchw.dtype).itemsize
    in_blk = BH * W * Cin * isz
    out_blk = BH * W * C2 * osz
    w_bytes = (3 * W * Cin * W * C1 + 3 * W * C1 * W * C2) * isz + (W * C1 + W * C2) * 4
    op_bytes = BH * (3 * W * Cin + 3 * W * C1) * isz + BH * (W * C1 + W * C2) * 4
    try:
        vmem_cap = int(getattr(pltpu.get_tpu_info(), "vmem_capacity_bytes", 64 << 20))
    except Exception:
        vmem_cap = 64 << 20                                   # assume smallest (v7x) capacity
    need = 2 * (in_blk + out_blk) + 2 * w_bytes + op_bytes + (2 << 20)
    vmem_limit = int(min(max(need, 4 << 20), max(vmem_cap - (8 << 20), 16 << 20)))

    flops = int(2 * N * H * (3 * W * Cin * W * C1 + 3 * W * C1 * W * C2))
    bytes_accessed = int(N * H * W * Cin * isz + w_bytes + N * H * W * C2 * osz)

    out_flat = pl.pallas_call(
        _make_fused_kernel(B, H, compute_dtype),
        out_shape=jax.ShapeDtypeStruct((N * H, W * C2), x_nchw.dtype),
        grid_spec=pltpu.PrefetchScalarGridSpec(
            num_scalar_prefetch=0,
            grid=(N // B,),
            in_specs=[
                # B whole images per step -> MXU M dimension = B*H.
                pl.BlockSpec((BH, W * Cin), lambda i: (i, 0)),
                # Resident weights / biases (constant index_map -> DMA'd once).
                # TODO(synk): on v7x, pipeline_mode=pl.Buffered(1) on these specs would
                # halve their double-buffered VMEM footprint.
                pl.BlockSpec((3 * W * Cin, W * C1), lambda i: (0, 0)),
                pl.BlockSpec((1, W * C1), lambda i: (0, 0)),
                pl.BlockSpec((3 * W * C1, W * C2), lambda i: (0, 0)),
                pl.BlockSpec((1, W * C2), lambda i: (0, 0)),
            ],
            out_specs=pl.BlockSpec((BH, W * C2), lambda i: (i, 0)),   # lane-dense slab
        ),
        compiler_params=pltpu.CompilerParams(
            dimension_semantics=("parallel",),
            vmem_limit_bytes=vmem_limit),
        cost_estimate=pl.CostEstimate(flops=flops, transcendentals=0,
                                      bytes_accessed=bytes_accessed),
    )(x_flat, w1t, b1t, w2t, b2t)

    out = out_flat.reshape(N, H, W, C2)
    return jnp.transpose(out, (0, 3, 1, 2))                   # NHWC -> NCHW


# ------------------------------- parameter init -----------------------------------------

def init_params(key, cin, cout):
    def layer(k, ci, co):
        kw, kg, kb, km, kv = jax.random.split(k, 5)
        w_oihw = 0.1 * jax.random.normal(kw, (co, ci, 3, 3), jnp.float32)
        w_hwio = jnp.transpose(w_oihw, (2, 3, 1, 0))          # -> (3, 3, Cin, Cout)
        gamma = 1.0 + 0.1 * jax.random.normal(kg, (co,), jnp.float32)
        beta = 0.1 * jax.random.normal(kb, (co,), jnp.float32)
        mean = 0.1 * jax.random.normal(km, (co,), jnp.float32)
        var = 0.5 + jnp.abs(jax.random.normal(kv, (co,), jnp.float32))
        return (w_hwio, gamma, beta, mean, var)
    k1, k2 = jax.random.split(key)
    return [layer(k1, cin, cout), layer(k2, cout, cout)]


# ------------------------------- pure-XLA reference -------------------------------------

def reference(x_nchw, params, compute_dtype=jnp.float32):
    """XLA reference. With compute_dtype=bfloat16 it mirrors the kernel's dtype strategy
    (bf16 conv operands, f32 accumulation, f32 BN-bias + LeakyReLU)."""
    x = jnp.transpose(x_nchw, (0, 2, 3, 1)).astype(jnp.float32)
    for (w_hwio, gamma, beta, mean, var) in params:
        scale, bias = _fold_bn(gamma, beta, mean, var)
        w_s = (w_hwio * scale.reshape(1, 1, 1, -1)).astype(compute_dtype)
        xp = jnp.pad(x.astype(compute_dtype), ((0, 0), (1, 1), (1, 1), (0, 0)),
                     mode="reflect")
        y = lax.conv_general_dilated(
            xp, w_s, window_strides=(1, 1), padding="VALID",
            dimension_numbers=("NHWC", "HWIO", "NHWC"),
            preferred_element_type=jnp.float32)
        y = y + bias.astype(jnp.float32)
        x = jnp.where(y > 0, y, LEAKY_SLOPE * y)
    return jnp.transpose(x, (0, 3, 1, 2))


# -------------------------------------- main --------------------------------------------

if __name__ == "__main__":
    key = jax.random.PRNGKey(0)
    kx, kp = jax.random.split(key)

    N, Cin, H, W = 2, 4, 16, 16
    Cout = 8
    x = jax.random.normal(kx, (N, Cin, H, W), jnp.float32)
    params = init_params(kp, Cin, Cout)

    out = jax.block_until_ready(convolutional_block(x, params))
    assert out.shape == (N, Cout, H, W), out.shape

    # Tight check vs a reference that mirrors the kernel's bf16/f32 dtype strategy.
    ref_bf16 = jax.block_until_ready(reference(x, params, compute_dtype=jnp.bfloat16))
    assert jnp.allclose(out, ref_bf16, atol=2e-2, rtol=2e-2), \
        f"max abs err vs bf16 reference: {jnp.max(jnp.abs(out - ref_bf16))}"

    # Loose sanity check vs the full-f32 reference (kernel uses bf16 MXU operands).
    ref_f32 = jax.block_until_ready(reference(x, params, compute_dtype=jnp.float32))
    assert jnp.allclose(out, ref_f32, atol=1e-1, rtol=1e-1), \
        f"max abs err vs f32 reference: {jnp.max(jnp.abs(out - ref_f32))}"

    print("KERNEL_OK")
</pallas_src>

<mosaic_0001>
module attributes {stable_mosaic.version = 11 : i64} {
  func.func @kernel(%arg0: i32, %arg1: memref<32x64xbf16, #tpu.memory_space<vmem>>, %arg2: memref<192x128xbf16, #tpu.memory_space<vmem>>, %arg3: memref<1x128xf32, #tpu.memory_space<vmem>>, %arg4: memref<384x128xbf16, #tpu.memory_space<vmem>>, %arg5: memref<1x128xf32, #tpu.memory_space<vmem>>, %arg6: memref<32x128xf32, #tpu.memory_space<vmem>>) attributes {dimension_semantics = [#tpu.dimension_semantics<parallel>], iteration_bounds = array<i64: 1>, scalar_prefetch = 0 : i64, scratch_operands = 0 : i64, tpu.core_type = #tpu.core_type<tc>, window_params = [{transform_indices = @transform_0, window_bounds = array<i64: 32, 64>}, {pipeline_mode = #tpu.pipeline_mode<synchronous>, transform_indices = @transform_1, window_bounds = array<i64: 192, 128>}, {pipeline_mode = #tpu.pipeline_mode<synchronous>, transform_indices = @transform_2, window_bounds = array<i64: 1, 128>}, {pipeline_mode = #tpu.pipeline_mode<synchronous>, transform_indices = @transform_3, window_bounds = array<i64: 384, 128>}, {pipeline_mode = #tpu.pipeline_mode<synchronous>, transform_indices = @transform_4, window_bounds = array<i64: 1, 128>}, {transform_indices = @transform_5, window_bounds = array<i64: 32, 128>}]} {
    %c0 = arith.constant 0 : index
    %c0_0 = arith.constant 0 : index
    %0 = vector.load %arg1[%c0, %c0_0] : memref<32x64xbf16, #tpu.memory_space<vmem>>, vector<32x64xbf16>
    %1 = vector.extract_strided_slice %0 {offsets = [31, 0], sizes = [1, 64], strides = [1, 1]} : vector<32x64xbf16> to vector<1x64xbf16>
    %2 = vector.extract_strided_slice %0 {offsets = [0, 0], sizes = [31, 64], strides = [1, 1]} : vector<32x64xbf16> to vector<31x64xbf16>
    %3 = tpu.concatenate %1, %2 in 0 : vector<1x64xbf16>, vector<31x64xbf16> -> vector<32x64xbf16>
    %4 = vector.extract_strided_slice %0 {offsets = [1, 0], sizes = [31, 64], strides = [1, 1]} : vector<32x64xbf16> to vector<31x64xbf16>
    %5 = vector.extract_strided_slice %0 {offsets = [0, 0], sizes = [1, 64], strides = [1, 1]} : vector<32x64xbf16> to vector<1x64xbf16>
    %6 = tpu.concatenate %4, %5 in 0 : vector<31x64xbf16>, vector<1x64xbf16> -> vector<32x64xbf16>
    %7 = tpu.iota {dimensions = array<i32: 0>} : vector<32x1xi32>
    %c16_i32 = arith.constant 16 : i32
    %c0_i32 = arith.constant 0 : i32
    %8 = arith.cmpi eq, %c16_i32, %c0_i32 : i32
    %c1_i32 = arith.constant 1 : i32
    %9 = arith.select %8, %c1_i32, %c16_i32 : i32
    %10 = vector.broadcast %9 : i32 to vector<32x1xi32>
    %11 = arith.remsi %7, %10 : vector<32x1xi32>
    %c0_i32_1 = arith.constant 0 : i32
    %12 = vector.broadcast %c0_i32_1 : i32 to vector<32x1xi32>
    %13 = arith.cmpi ne, %11, %12 : vector<32x1xi32>
    %c0_i32_2 = arith.constant 0 : i32
    %14 = vector.broadcast %c0_i32_2 : i32 to vector<32x1xi32>
    %15 = arith.cmpi slt, %11, %14 : vector<32x1xi32>
    %c0_i32_3 = arith.constant 0 : i32
    %16 = arith.cmpi slt, %9, %c0_i32_3 : i32
    %17 = vector.broadcast %16 : i1 to vector<32x1xi1>
    %18 = vector.broadcast %17 : vector<32x1xi1> to vector<32x1xi1>
    %19 = arith.xori %15, %18 : vector<32x1xi1>
    %20 = arith.andi %19, %13 : vector<32x1xi1>
    %21 = vector.broadcast %9 : i32 to vector<32x1xi32>
    %22 = arith.addi %11, %21 : vector<32x1xi32>
    %23 = arith.select %20, %22, %11 : vector<32x1xi1>, vector<32x1xi32>
    %c0_i32_4 = arith.constant 0 : i32
    %24 = vector.broadcast %c0_i32_4 : i32 to vector<32x1xi32>
    %25 = arith.cmpi eq, %23, %24 : vector<32x1xi32>
    %26 = vector.shape_cast %25 : vector<32x1xi1> to vector<32x1xi1>
    %27 = vector.broadcast %26 : vector<32x1xi1> to vector<32x64xi1>
    %28 = arith.select %27, %6, %3 : vector<32x64xi1>, vector<32x64xbf16>
    %c15_i32 = arith.constant 15 : i32
    %29 = vector.broadcast %c15_i32 : i32 to vector<32x1xi32>
    %30 = arith.cmpi eq, %23, %29 : vector<32x1xi32>
    %31 = vector.shape_cast %30 : vector<32x1xi1> to vector<32x1xi1>
    %32 = vector.broadcast %31 : vector<32x1xi1> to vector<32x64xi1>
    %33 = arith.select %32, %3, %6 : vector<32x64xi1>, vector<32x64xbf16>
    %34 = tpu.concatenate %28, %0, %33 in 1 : vector<32x64xbf16>, vector<32x64xbf16>, vector<32x64xbf16> -> vector<32x192xbf16>
    %c0_5 = arith.constant 0 : index
    %c0_6 = arith.constant 0 : index
    %35 = vector.load %arg2[%c0_5, %c0_6] : memref<192x128xbf16, #tpu.memory_space<vmem>>, vector<192x128xbf16>
    %cst = arith.constant dense<0.000000e+00> : vector<32x128xf32>
    %36 = tpu.matmul %34, %35, %cst {dimension_numbers = #tpu.dot_dimension_numbers<[1], [0], [0], [1], [0, 0, 1, 1], [], []>} : vector<32x192xbf16>, vector<192x128xbf16>, vector<32x128xf32> -> vector<32x128xf32>
    %c0_7 = arith.constant 0 : index
    %c0_8 = arith.constant 0 : index
    %37 = vector.load %arg3[%c0_7, %c0_8] : memref<1x128xf32, #tpu.memory_space<vmem>>, vector<1x128xf32>
    %38 = vector.broadcast %37 : vector<1x128xf32> to vector<32x128xf32>
    %39 = arith.addf %36, %38 : vector<32x128xf32>
    %cst_9 = arith.constant 0.000000e+00 : f32
    %40 = vector.broadcast %cst_9 : f32 to vector<32x128xf32>
    %41 = arith.cmpf ogt, %39, %40 : vector<32x128xf32>
    %cst_10 = arith.constant 0.00999999977 : f32
    %42 = vector.broadcast %cst_10 : f32 to vector<32x128xf32>
    %43 = arith.mulf %42, %39 : vector<32x128xf32>
    %44 = arith.select %41, %39, %43 : vector<32x128xi1>, vector<32x128xf32>
    %45 = arith.truncf %44 : vector<32x128xf32> to vector<32x128xbf16>
    %46 = vector.extract_strided_slice %45 {offsets = [31, 0], sizes = [1, 128], strides = [1, 1]} : vector<32x128xbf16> to vector<1x128xbf16>
    %47 = vector.extract_strided_slice %45 {offsets = [0, 0], sizes = [31, 128], strides = [1, 1]} : vector<32x128xbf16> to vector<31x128xbf16>
    %48 = tpu.concatenate %46, %47 in 0 : vector<1x128xbf16>, vector<31x128xbf16> -> vector<32x128xbf16>
    %49 = vector.extract_strided_slice %45 {offsets = [1, 0], sizes = [31, 128], strides = [1, 1]} : vector<32x128xbf16> to vector<31x128xbf16>
    %50 = vector.extract_strided_slice %45 {offsets = [0, 0], sizes = [1, 128], strides = [1, 1]} : vector<32x128xbf16> to vector<1x128xbf16>
    %51 = tpu.concatenate %49, %50 in 0 : vector<31x128xbf16>, vector<1x128xbf16> -> vector<32x128xbf16>
    %52 = tpu.iota {dimensions = array<i32: 0>} : vector<32x1xi32>
    %c16_i32_11 = arith.constant 16 : i32
    %c0_i32_12 = arith.constant 0 : i32
    %53 = arith.cmpi eq, %c16_i32_11, %c0_i32_12 : i32
    %c1_i32_13 = arith.constant 1 : i32
    %54 = arith.select %53, %c1_i32_13, %c16_i32_11 : i32
    %55 = vector.broadcast %54 : i32 to vector<32x1xi32>
    %56 = arith.remsi %52, %55 : vector<32x1xi32>
    %c0_i32_14 = arith.constant 0 : i32
    %57 = vector.broadcast %c0_i32_14 : i32 to vector<32x1xi32>
    %58 = arith.cmpi ne, %56, %57 : vector<32x1xi32>
    %c0_i32_15 = arith.constant 0 : i32
    %59 = vector.broadcast %c0_i32_15 : i32 to vector<32x1xi32>
    %60 = arith.cmpi slt, %56, %59 : vector<32x1xi32>
    %c0_i32_16 = arith.constant 0 : i32
    %61 = arith.cmpi slt, %54, %c0_i32_16 : i32
    %62 = vector.broadcast %61 : i1 to vector<32x1xi1>
    %63 = vector.broadcast %62 : vector<32x1xi1> to vector<32x1xi1>
    %64 = arith.xori %60, %63 : vector<32x1xi1>
    %65 = arith.andi %64, %58 : vector<32x1xi1>
    %66 = vector.broadcast %54 : i32 to vector<32x1xi32>
    %67 = arith.addi %56, %66 : vector<32x1xi32>
    %68 = arith.select %65, %67, %56 : vector<32x1xi1>, vector<32x1xi32>
    %c0_i32_17 = arith.constant 0 : i32
    %69 = vector.broadcast %c0_i32_17 : i32 to vector<32x1xi32>
    %70 = arith.cmpi eq, %68, %69 : vector<32x1xi32>
    %71 = vector.shape_cast %70 : vector<32x1xi1> to vector<32x1xi1>
    %72 = vector.broadcast %71 : vector<32x1xi1> to vector<32x128xi1>
    %73 = arith.select %72, %51, %48 : vector<32x128xi1>, vector<32x128xbf16>
    %c15_i32_18 = arith.constant 15 : i32
    %74 = vector.broadcast %c15_i32_18 : i32 to vector<32x1xi32>
    %75 = arith.cmpi eq, %68, %74 : vector<32x1xi32>
    %76 = vector.shape_cast %75 : vector<32x1xi1> to vector<32x1xi1>
    %77 = vector.broadcast %76 : vector<32x1xi1> to vector<32x128xi1>
    %78 = arith.select %77, %48, %51 : vector<32x128xi1>, vector<32x128xbf16>
    %79 = tpu.concatenate %73, %45, %78 in 1 : vector<32x128xbf16>, vector<32x128xbf16>, vector<32x128xbf16> -> vector<32x384xbf16>
    %c0_19 = arith.constant 0 : index
    %c0_20 = arith.constant 0 : index
    %80 = vector.load %arg4[%c0_19, %c0_20] : memref<384x128xbf16, #tpu.memory_space<vmem>>, vector<384x128xbf16>
    %cst_21 = arith.constant dense<0.000000e+00> : vector<32x128xf32>
    %81 = tpu.matmul %79, %80, %cst_21 {dimension_numbers = #tpu.dot_dimension_numbers<[1], [0], [0], [1], [0, 0, 1, 1], [], []>} : vector<32x384xbf16>, vector<384x128xbf16>, vector<32x128xf32> -> vector<32x128xf32>
    %c0_22 = arith.constant 0 : index
    %c0_23 = arith.constant 0 : index
    %82 = vector.load %arg5[%c0_22, %c0_23] : memref<1x128xf32, #tpu.memory_space<vmem>>, vector<1x128xf32>
    %83 = vector.broadcast %82 : vector<1x128xf32> to vector<32x128xf32>
    %84 = arith.addf %81, %83 : vector<32x128xf32>
    %cst_24 = arith.constant 0.000000e+00 : f32
    %85 = vector.broadcast %cst_24 : f32 to vector<32x128xf32>
    %86 = arith.cmpf ogt, %84, %85 : vector<32x128xf32>
    %cst_25 = arith.constant 0.00999999977 : f32
    %87 = vector.broadcast %cst_25 : f32 to vector<32x128xf32>
    %88 = arith.mulf %87, %84 : vector<32x128xf32>
    %89 = arith.select %86, %84, %88 : vector<32x128xi1>, vector<32x128xf32>
    %c0_26 = arith.constant 0 : index
    %c0_27 = arith.constant 0 : index
    %90 = vector.load %arg6[%c0_26, %c0_27] : memref<32x128xf32, #tpu.memory_space<vmem>>, vector<32x128xf32>
    tpu.vector_store %arg6[%c0_26, %c0_27], %89 {strides = array<i32>} : memref<32x128xf32, #tpu.memory_space<vmem>>, vector<32x128xf32>,
    return
  }
  func.func @transform_0(%arg0: i32) -> (i32, i32) {
    %c0_i32 = arith.constant 0 : i32
    %c0_i32_0 = arith.constant 0 : i32
    return %arg0, %c0_i32 : i32, i32
  }
  func.func @transform_1(%arg0: i32) -> (i32, i32) {
    %c0_i32 = arith.constant 0 : i32
    %c0_i32_0 = arith.constant 0 : i32
    %c0_i32_1 = arith.constant 0 : i32
    return %c0_i32, %c0_i32_0 : i32, i32
  }
  func.func @transform_2(%arg0: i32) -> (i32, i32) {
    %c0_i32 = arith.constant 0 : i32
    %c0_i32_0 = arith.constant 0 : i32
    %c0_i32_1 = arith.constant 0 : i32
    return %c0_i32, %c0_i32_0 : i32, i32
  }
  func.func @transform_3(%arg0: i32) -> (i32, i32) {
    %c0_i32 = arith.constant 0 : i32
    %c0_i32_0 = arith.constant 0 : i32
    %c0_i32_1 = arith.constant 0 : i32
    return %c0_i32, %c0_i32_0 : i32, i32
  }
  func.func @transform_4(%arg0: i32) -> (i32, i32) {
    %c0_i32 = arith.constant 0 : i32
    %c0_i32_0 = arith.constant 0 : i32
    %c0_i32_1 = arith.constant 0 : i32
    return %c0_i32, %c0_i32_0 : i32, i32
  }
  func.func @transform_5(%arg0: i32) -> (i32, i32) {
    %c0_i32 = arith.constant 0 : i32
    %c0_i32_0 = arith.constant 0 : i32
    return %arg0, %c0_i32 : i32, i32
  }
}

</mosaic_0001>

<bundles_post_ra>
// kernel: tpu_custom_call.1
= control target key start
LH: loop header
LB: loop body
LE: loop exit
PB: predicated region body
PF: predicated region fallthrough
CT: control target
= control target key end

     0   :  { %10 = vsyncpa [#allocation3], 0  ;;  %s1197_s0 = inlined_call_operand.hbm [shape: bf16[32,64], index: 0, kind: input, shape index: {}]   ;;  %s1198_s1 = inlined_call_operand.hbm [shape: bf16[192,128], index: 1, kind: input, shape index: {}]   ;;  %s1199_s2 = inlined_call_operand.vmem [shape: f32[1,128], index: 2, kind: input, shape index: {}]   ;;  %s1200_s3 = inlined_call_operand.hbm [shape: bf16[384,128], index: 3, kind: input, shape index: {}]   ;;  %s1201_s4 = inlined_call_operand.vmem [shape: f32[1,128], index: 4, kind: input, shape index: {}]   ;;  %s1202_s5 = inlined_call_operand.hbm [shape: f32[32,128], index: 5, kind: output, shape index: {}]  }
   0x1   :  { %11 = vsyncpa [#allocation6], 0 }
   0x2   :  { %12 = vsyncpa [#allocation4], 0  ;;  %s1026_s18 = smov [#allocation5]   ;;  %s1027_s20 = smov [#allocation2]  }
   0x3   :  { %s30_s19 = sshll.u32 %s1026_s18, 4  ;;  %s18_s21 = sshll.u32 %s1027_s20, 4  ;;  %s31_s19 = int_to_ptr.vmem [resolvable:$true] %s30_s19  ;;  %s19_s21 = int_to_ptr.vmem [resolvable:$true] %s18_s21 }
   0x4   :  { %s948_s22 = scalar_lea.vmem %s31_s19, 1536  ;;  %p953_p1 = scmp.lt.s32.totalorder %s31_s19, %s31_s19 }
   0x5   :  { %p949_p0 = scmp.ne.s32.totalorder %s31_s19, %s948_s22  ;;  %p954_p2 = scmp.lt.s32.totalorder %s948_s22, %s948_s22 }
   0x7   :  { %p955_p3 = por %p954_p2, %p953_p1 }
   0x9   :  { %p956_p4 = pnand %p955_p3, %p949_p0 }
   0xb   :  { %959 = shalt.err (!%p956_p4)
}
   0xc   :  { %s1028_s23 = smov 64   ;;  %s1029_s24 = smov 4  }
   0xd   :  { %36 = dma.hbm_to_vmem [thread:$0]  %s1198_s1, 1536, %s31_s19, [#allocation6], %s1028_s23, %s1028_s23, %s1029_s24  }
   0xe   :  { %s968_s27 = scalar_lea.vmem %s19_s21, 256  ;;  %p973_p6 = scmp.lt.s32.totalorder %s19_s21, %s19_s21 }
   0xf   :  { %p969_p5 = scmp.ne.s32.totalorder %s19_s21, %s968_s27  ;;  %p974_p7 = scmp.lt.s32.totalorder %s968_s27, %s968_s27 }
  0x11   :  { %p975_p8 = por %p974_p7, %p973_p6 }
  0x13   :  { %p976_p9 = pnand %p975_p8, %p969_p5 }
  0x15   :  { %979 = shalt.err (!%p976_p9)
}
  0x16   :  { %24 = dma.hbm_to_vmem [thread:$0]  %s1197_s0, 256, %s19_s21, [#allocation3], %s1028_s23, %s1028_s23, %s1029_s24  }
  0x17   :  { %s1030_s30 = smov [#allocation7]  }
  0x18   :  { %s44_s6 = sshll.u32 %s1030_s30, 4  ;;  %s45_s6 = int_to_ptr.vmem [resolvable:$true] %s44_s6 }
  0x19   :  { %s988_s7 = scalar_lea.vmem %s45_s6, 3072  ;;  %p993_p11 = scmp.lt.s32.totalorder %s45_s6, %s45_s6 }
  0x1a   :  { %p989_p10 = scmp.ne.s32.totalorder %s45_s6, %s988_s7  ;;  %p994_p12 = scmp.lt.s32.totalorder %s988_s7, %s988_s7 }
  0x1c   :  { %p995_p13 = por %p994_p12, %p993_p11 }
  0x1e   :  { %p996_p0 = pnand %p995_p13, %p989_p10 }
  0x20   :  { %999 = shalt.err (!%p996_p0)
}
  0x21   :  { %50 = dma.hbm_to_vmem [thread:$0]  %s1200_s3, 3072, %s45_s6, [#allocation6], %s1028_s23, %s1028_s23, %s1029_s24  }
  0x22   :  { %1020 = dma.done.wait [#allocation3], 256  }
  0x23   :  { %1021 = vsyncadd [#allocation3], 4294967040 }
  0x24   :  { %1022 = dma.done.wait [#allocation6], 4608  }
  0x25   :  { %1023 = vsyncadd [#allocation6], 4294962688  ;;  %v123_v0 = vlaneseq  ;;  %v1031_v1 = vmov 0   ;;  %vm85_vm0 = vsmask.f32 256  ;;  %vm103_vm1 = vcmask 1040384  }
  0x26   :  { %358 = vmatprep.subr.bf16.mxu0 %v1031_v1  ;;  %vm120_vm2 = vcmask 1047552   ;;  %vm1032_vm3 = vmmov 0   ;;  %v65_v6 = vld [vmem:[#allocation2] sm:$0xf]  ;;  %v66_v7 = vld [vmem:[#allocation2 + $0x4] sm:$0xf]  ;;  %vm1097_vm9 = vmand %vm103_vm1, %vm85_vm0 }
  0x27   :  { %v124_v2 = vshrl.u32 %v123_v0, 7  ;;  %vm189_vm4 = vmpackc.low %vm1032_vm3, %vm1032_vm3  ;;  %v67_v8 = vld [vmem:[#allocation2 + $0x8] sm:$0xf]  ;;  %v785_v9 = vcombine.low %v65_v6, %v66_v7  ;;  %v787_v10 = vcombine.low %v65_v6, %v65_v6  ;;  %v68_v11 = vld [vmem:[#allocation2 + $0xc] sm:$0xf]  ;;  %vm240_vm8 = vcmask 523264  }
  0x28   :  { %vm106_vm5 = vsmask.f32 7424  ;;  %v784_v12 = vcombine.low %v68_v11, %v68_v11  ;;  %v786_v13 = vcombine.low %v67_v8, %v68_v11  ;;  %v904_v14 = vld [vmem:[#allocation5 + $0x38] sm:$0xff]   ;;  %v1083_v15 = vsel %vm189_vm4, 65537, %v1031_v1  ;;  %v905_v23 = vld [vmem:[#allocation5 + $0x30] sm:$0xff]   ;;  %v906_v28 = vld [vmem:[#allocation5 + $0x28] sm:$0xff]  }
  0x29   :  { %v125_v3 = vadd.s32 8, %v124_v2  ;;  %v132_v5 = vand.u32 15, %v124_v2  ;;  %236 = vrot.lane.b32.xlu0 %v785_v9, %s1028_s23  ;;  %v87_v16 = vshrl.u32 %v785_v9, 16  ;;  %v127_v19 = vadd.s32 24, %v124_v2  ;;  %359 = vmatpush1.bf16.msra.mxu0 %v904_v14  ;;  %vm1111_vm12 = vmand %vm120_vm2, %vm106_vm5  ;;  %v907_v46 = vld [vmem:[#allocation5 + $0x20] sm:$0xff]   ;;  %v908_v51 = vld [vmem:[#allocation5 + $0x18] sm:$0xff]  }
  0x2a   :  { %v90_v20 = vshll.u32 %v785_v9, 16  ;;  %v73_v21 = vshrl.u32 %v784_v12, 16  ;;  %v94_v22 = vshrl.u32 %v786_v13, 16  ;;  %v116_v24 = vshll.u32 %v787_v10, 16  ;;  %360 = vmatprep.subr.bf16.mxu0 %v1031_v1  ;;  %v916_v57 = vld [vmem:[#allocation7 + $0x78] sm:$0xff]   ;;  %v918_v60 = vld [vmem:[#allocation7 + $0x70] sm:$0xff]  }
  0x2b   :  { %v139_v4 = vand.u32 15, %v125_v3  ;;  %vm1090_vm7 = vcmp.eq.s32.totalorder %v132_v5, 0  ;;  %v97_v25 = vshll.u32 %v786_v13, 16  ;;  %v89_v30 = vrot.slane %v87_v16, 7  ;;  %v917_v59 = vld [vmem:[#allocation7 + $0x38] sm:$0xff]   ;;  %832 = vmatprep.subr.bf16.mxu1 %v916_v57  ;;  %v909_v63 = vld [vmem:[#allocation5 + $0x10] sm:$0xff]  }
  0x2c   :  { %v96_v27 = vrot.slane %v94_v22, 7  ;;  %v75_v29 = vrot.slane %v73_v21, 3  ;;  %v107_v31 = vrot.slane %v90_v20, 1  ;;  %vm188_vm11 = vmpackc.low %vm1090_vm7, %vm1090_vm7  ;;  %v153_v33 = vand.u32 15, %v127_v19  ;;  %833 = vmatpush3.bf16.msra.mxu1 %v917_v59  ;;  %v919_v3 = vld [vmem:[#allocation7 + $0x30] sm:$0xff]   ;;  %v910_v5 = vld [vmem:[#allocation5 + $0x8] sm:$0xff]  }
  0x2d   :  { %vm1086_vm6 = vcmp.eq.s32.totalorder %v139_v4, 15  ;;  %238 = vrot.lane.b32.xlu0 %v786_v13, %s1028_s23  ;;  %361 = vmatpush1.bf16.msra.mxu0 %v905_v23  ;;  %v118_v34 = vrot.slane %v116_v24, 1  ;;  %v92_v35 = vor.u32 %v90_v20, %v89_v30  ;;  %v109_v36 = vrot.slane %v97_v25, 1  ;;  %v911_v7 = vld [vmem:[#allocation5] sm:$0xff]   ;;  %v912_v8 = vld [vmem:[#allocation5 + $0x58] sm:$0xff]   ;;  %v913_v9 = vld [vmem:[#allocation5 + $0x50] sm:$0xff]  }
  0x2e   :  { %vm219_vm10 = vmpackc.low %vm1086_vm6, %vm1086_vm6  ;;  %v99_v32 = vor.u32 %v97_v25, %v96_v27  ;;  %362 = vmatprep.subr.bf16.mxu0 %v1031_v1  ;;  %v108_v37 = vor.u32 %v107_v31, %v87_v16  ;;  %v126_v41 = vadd.s32 16, %v124_v2  ;;  %v192_v45 = vsel %vm188_vm11, 65537, %v1031_v1  ;;  %834 = vmatprep.subr.bf16.mxu1 %v918_v60  ;;  %v914_v10 = vld [vmem:[#allocation5 + $0x48] sm:$0xff]   ;;  %v915_v11 = vld [vmem:[#allocation5 + $0x40] sm:$0xff]  }
  0x2f   :  { %v223_v39 = vsel %vm219_vm10, 65537, %v1031_v1  ;;  %v1121_v42 = vsel %vm1097_vm9, %v75_v29, %v92_v35  ;;  %v111_v43 = vor.u32 %v109_v36, %v94_v22  ;;  %v788_v48 = vcombine.low %v192_v45, %v1083_v15  ;;  %v920_v16 = vld [vmem:[#allocation7 + $0x68] sm:$0xff]   ;;  %v922_v18 = vld [vmem:[#allocation7 + $0x60] sm:$0xff]   ;;  %v925_v20 = vld [vmem:[#allocation7 + $0x18] sm:$0xff]  }
  0x30   :  { %v1117_v40 = vsel %vm85_vm0, %v89_v30, %v99_v32  ;;  %v790_v44 = vcombine.low %v1083_v15, %v223_v39  ;;  %v110_v47 = vsel %vm106_vm5, %v108_v37, %v109_v36  ;;  %vm209_vm13 = vcmp.eq.s32.totalorder %v153_v33, 15  ;;  %835 = vmatpush3.bf16.msra.mxu1 %v919_v3  ;;  %v921_v17 = vld [vmem:[#allocation7 + $0x28] sm:$0xff]   ;;  %v923_v19 = vld [vmem:[#allocation7 + $0x20] sm:$0xff]   ;;  %v926_v21 = vld [vmem:[#allocation7 + $0x50] sm:$0xff]  }
  0x31   :  { %363 = vmatpush1.bf16.msra.mxu0 %v906_v28  ;;  %v122_v50 = vsel %vm1111_vm12, %v111_v43, %v118_v34  ;;  %vm1137_vm15 = vcmp.ne.s16.totalorder %v788_v48, 0  ;;  %vm221_vm1 = vmpackc.low %vm209_vm13, %vm209_vm13  ;;  %v146_v54 = vand.u32 15, %v126_v41  ;;  %836 = vmatprep.subr.bf16.mxu1 %v920_v16  ;;  %v927_v22 = vld [vmem:[#allocation7 + $0x10] sm:$0xff]   ;;  %v928_v23 = vld [vmem:[#allocation7 + $0x48] sm:$0xff]  }
  0x32   :  { %364 = vmatprep.subr.bf16.mxu0 %v1031_v1  ;;  %vm1128_vm14 = vcmp.ne.s16.totalorder %v790_v44, 0  ;;  %v204_v55 = vsel %vm1137_vm15, %v110_v47, %v1121_v42  ;;  %v225_v56 = vsel %vm221_vm1, 65537, %v1031_v1  ;;  %v929_v24 = vld [vmem:[#allocation7 + $0x8] sm:$0xff]   ;;  %v930_v25 = vld [vmem:[#allocation7 + $0x40] sm:$0xff]   ;;  %v932_v28 = vld [vmem:[#allocation7 + $0xb8] sm:$0xff]  }
  0x33   :  { %v234_v52 = vsel %vm1128_vm14, %v1121_v42, %v110_v47  ;;  %v791_v58 = vcombine.low %v1083_v15, %v225_v56  ;;  %vm178_vm2 = vcmp.eq.s32.totalorder %v146_v54, 0  ;;  %v931_v27 = vld [vmem:[#allocation7] sm:$0xff]   ;;  %v792_v29 = vld [vmem:[%s1199_s2] ss:$0 sm:$0xff]  ;;  %v938_v38 = vld [vmem:[#allocation7 + $0x88] sm:$0xff]  }
  0x34   :  { %805 = vmatprep.mubr.msk.bf16.mxu0 %vm240_vm8, %v234_v52  ;;  %vm190_vm3 = vmpackc.low %vm178_vm2, %vm178_vm2  ;;  %837 = vmatpush3.bf16.msra.mxu1 %v921_v17  ;;  %v935_v26 = vld [vmem:[#allocation7 + $0xa0] sm:$0xff]  }
  0x35   :  { %365 = vmatpush1.bf16.msra.mxu0 %v907_v46  ;;  %vm1148_vm4 = vcmp.ne.s16.totalorder %v791_v58, 0  ;;  %v194_v62 = vsel %vm190_vm3, 65537, %v1031_v1  ;;  %838 = vmatprep.subr.bf16.mxu1 %v922_v18  ;;  %v939_v16 = vld [vmem:[#allocation7 + $0x80] sm:$0xff]  }
  0x36   :  { %366 = vmatprep.subr.bf16.mxu0 %v1031_v1  ;;  %v235_v0 = vsel %vm1148_vm4, %v1117_v40, %v122_v50  ;;  %v789_v2 = vcombine.low %v194_v62, %v1083_v15 }
  0x38   :  { %vm1158_vm6 = vcmp.ne.s16.totalorder %v789_v2, 0  ;;  %839 = vmatpush3.bf16.msra.mxu1 %v923_v19 }
  0x39   :  { %367 = vmatpush1.bf16.msra.mxu0 %v908_v51  ;;  %v205_v6 = vsel %vm1158_vm6, %v122_v50, %v1117_v40 }
  0x3a   :  { %368 = vmatprep.subr.bf16.mxu0 %v1031_v1 }
  0x3d   :  { %369 = vmatpush1.bf16.msra.mxu0 %v909_v63 }
  0x3e   :  { %370 = vmatprep.subr.bf16.mxu0 %v1031_v1 }
  0x41   :  { %371 = vmatpush1.bf16.msra.mxu0 %v910_v5 }
  0x42   :  { %372 = vmatprep.subr.bf16.mxu0 %v1031_v1 }
  0x45   :  { %373 = vmatpush1.bf16.msra.mxu0 %v911_v7 }
  0x46   :  { %382 = vmatprep.subr.bf16.mxu0 %v1031_v1 }
  0x49   :  { %383 = vmatpush2.bf16.msra.mxu0 %v912_v8 }
  0x4a   :  { %384 = vmatprep.subr.bf16.mxu0 %v1031_v1 }
  0x4d   :  { %385 = vmatpush2.bf16.msra.mxu0 %v913_v9 }
  0x4e   :  { %386 = vmatprep.subr.bf16.mxu0 %v1031_v1 }
  0x51   :  { %387 = vmatpush2.bf16.msra.mxu0 %v914_v10  ;;  %v934_v10 = vld [vmem:[#allocation7 + $0xa8] sm:$0xff]  }
  0x52   :  { %388 = vmatprep.subr.bf16.mxu0 %v1031_v1  ;;  %v924_v1 = vld [vmem:[#allocation7 + $0x58] sm:$0xff]  }
  0x53   :  { %840 = vmatprep.subr.bf16.mxu1 %v924_v1 }
  0x54   :  { %841 = vmatpush3.bf16.msra.mxu1 %v925_v20 }
  0x55   :  { %389 = vmatpush2.bf16.msra.mxu0 %v915_v11  ;;  %842 = vmatprep.subr.bf16.mxu1 %v926_v21 }
  0x58   :  { %843 = vmatpush3.bf16.msra.mxu1 %v927_v22 }
  0x59   :  { %844 = vmatprep.subr.bf16.mxu1 %v928_v23 }
  0x5c   :  { %845 = vmatpush3.bf16.msra.mxu1 %v929_v24 }
  0x5d   :  { %846 = vmatprep.subr.bf16.mxu1 %v930_v25  ;;  %v807_v25 = vld [vmem:[%s1201_s4] ss:$0 sm:$0xff]  ;;  %s1033_s4 = smov [#allocation8]  }
  0x5e   :  { %s771_s10 = sshll.u32 %s1033_s4, 4  ;;  %s772_s10 = int_to_ptr.vmem [resolvable:$true] %s771_s10 }
  0x5f   :  { %s1000_s11 = scalar_lea.vmem %s772_s10, 512  ;;  %p1005_p2 = scmp.lt.s32.totalorder %s772_s10, %s772_s10 }
  0x60   :  { %847 = vmatpush3.bf16.msra.mxu1 %v931_v27  ;;  %p1001_p1 = scmp.ne.s32.totalorder %s772_s10, %s1000_s11  ;;  %p1006_p3 = scmp.lt.s32.totalorder %s1000_s11, %s1000_s11 }
  0x61   :  { %870 = vmatprep.subr.bf16.mxu1 %v932_v28 }
  0x62   :  { %p1007_p4 = por %p1006_p3, %p1005_p2 }
  0x64   :  { %p1008_p5 = pnand %p1007_p4, %p1001_p1 }
  0x9b   :  { %v237_v12 = vpop.permute.xlu0 %236 }
  0x9c   :  { %v243_v13 = vsel %vm240_vm8, %v204_v55, %v237_v12 }
  0x9d   :  { %391 = vmatmul.mubr.bf16.vlgmr.msra.gmra.mxu0 %v243_v13 }
  0x9e   :  { %806 = vmatprep.mubr.msk.bf16.mxu0 %vm240_vm8, %v235_v0 }
  0x9f   :  { %v239_v14 = vpop.permute.xlu0 %238 }
  0xa0   :  { %v247_v15 = vsel %vm240_vm8, %v205_v6, %v239_v14  ;;  %v933_v6 = vld [vmem:[#allocation7 + $0xb0] sm:$0xff]   ;;  %v936_v14 = vld [vmem:[#allocation7 + $0x98] sm:$0xff]  }
  0xa5   :  { %399 = vmatmul.mubr.bf16.gmra.mxu0 %v247_v15  ;;  %v937_v15 = vld [vmem:[#allocation7 + $0x90] sm:$0xff]  }
 0x15d   :  { %v392_v30 = vpop.f32.mrf.mxu0 }
 0x15e   :  { %v393_v31 = vadd.f32 %v792_v29, %v392_v30 }
 0x15f   :  { %v394_v32 = vpop.f32.mrf.mxu0 }
 0x160   :  { %v411_v34 = vmul.f32 0.01, %v393_v31  ;;  %vm407_vm7 = vcmp.gt.f32.partialorder %v393_v31, 0.0 }
 0x161   :  { %v395_v33 = vpop.f32.mrf.mxu0 }
 0x162   :  { %v396_v35 = vadd.f32 %v792_v29, %v395_v33  ;;  %v415_v41 = vsel %vm407_vm7, %v393_v31, %v411_v34 }
 0x163   :  { %v397_v36 = vpop.f32.mrf.mxu0 }
 0x164   :  { %vm408_vm8 = vcmp.gt.f32.partialorder %v396_v35, 0.0  ;;  %v412_v37 = vmul.f32 0.01, %v396_v35 }
 0x165   :  { %v400_v39 = vpop.f32.mrf.mxu0 }
 0x166   :  { %v401_v40 = vadd.f32 %v792_v29, %v400_v39  ;;  %v416_v42 = vsel %vm408_vm8, %v396_v35, %v412_v37 }
 0x167   :  { %v402_v43 = vpop.f32.mrf.mxu0  ;;  %v419_v44 = vpack.c.bf16 %v416_v42, %v415_v41 }
 0x168   :  { %v413_v46 = vmul.f32 0.01, %v401_v40  ;;  %vm409_vm10 = vcmp.gt.f32.partialorder %v401_v40, 0.0 }
 0x169   :  { %v403_v45 = vpop.f32.mrf.mxu0  ;;  %684 = vmatprep.mubr.bf16.mxu1 %v419_v44  ;;  %v427_v48 = vshrl.u32 %v419_v44, 16  ;;  %v430_v50 = vshll.u32 %v419_v44, 16 }
 0x16a   :  { %v404_v47 = vadd.f32 %v792_v29, %v403_v45  ;;  %v417_v54 = vsel %vm409_vm10, %v401_v40, %v413_v46 }
 0x16b   :  { %v405_v51 = vpop.f32.mrf.mxu0  ;;  %v429_v57 = vrot.slane %v427_v48, 7  ;;  %v440_v58 = vrot.slane %v430_v50, 1 }
 0x16c   :  { %vm410_vm11 = vcmp.gt.f32.partialorder %v404_v47, 0.0  ;;  %v414_v52 = vmul.f32 0.01, %v404_v47 }
 0x16d   :  { %v432_v63 = vor.u32 %v430_v50, %v429_v57  ;;  %v441_v0 = vor.u32 %v440_v58, %v427_v48 }
 0x16e   :  { %v418_v55 = vsel %vm410_vm11, %v404_v47, %v414_v52 }
 0x16f   :  { %v420_v56 = vpack.c.bf16 %v418_v55, %v417_v54 }
 0x171   :  { %v422_v59 = vshrl.u32 %v420_v56, 16  ;;  %v433_v60 = vshll.u32 %v420_v56, 16 }
 0x173   :  { %v424_v62 = vrot.slane %v422_v59, 7  ;;  %v442_v2 = vrot.slane %v433_v60, 1 }
 0x175   :  { %v439_v3 = vsel %vm1097_vm9, %v424_v62, %v432_v63  ;;  %v443_v5 = vsel %vm106_vm5, %v441_v0, %v442_v2  ;;  %v435_v8 = vor.u32 %v433_v60, %v424_v62  ;;  %v444_v9 = vor.u32 %v442_v2, %v422_v59 }
 0x176   :  { %v449_v7 = vsel %vm1137_vm15, %v443_v5, %v439_v3  ;;  %v451_v53 = vsel %vm1128_vm14, %v439_v3, %v443_v5 }
 0x177   :  { %685 = vmatmul.mubr.bf16.vlgmr.msra.gmra.mxu1 %v449_v7  ;;  %v436_v11 = vsel %vm85_vm0, %v429_v57, %v435_v8  ;;  %v448_v12 = vsel %vm1111_vm12, %v444_v9, %v440_v58 }
 0x178   :  { %871 = vmatpush3.bf16.msra.mxu1 %v932_v28  ;;  %692 = vmatprep.mubr.bf16.mxu1 %v420_v56  ;;  %v450_v13 = vsel %vm1158_vm6, %v448_v12, %v436_v11  ;;  %v452_v49 = vsel %vm1148_vm4, %v436_v11, %v448_v12 }
 0x179   :  { %872 = vmatprep.subr.bf16.mxu1 %v933_v6 }
 0x17c   :  { %873 = vmatpush3.bf16.msra.mxu1 %v933_v6 }
 0x17d   :  { %874 = vmatprep.subr.bf16.mxu1 %v934_v10 }
 0x17f   :  { %693 = vmatmul.mubr.bf16.gmra.mxu1 %v450_v13 }
 0x180   :  { %875 = vmatpush3.bf16.msra.mxu1 %v934_v10  ;;  %886 = vmatprep.mubr.bf16.mxu1 %v451_v53 }
 0x181   :  { %876 = vmatprep.subr.bf16.mxu1 %v935_v26 }
 0x184   :  { %877 = vmatpush3.bf16.msra.mxu1 %v935_v26 }
 0x185   :  { %878 = vmatprep.subr.bf16.mxu1 %v936_v14 }
 0x188   :  { %879 = vmatpush3.bf16.msra.mxu1 %v936_v14 }
 0x189   :  { %880 = vmatprep.subr.bf16.mxu1 %v937_v15 }
 0x18c   :  { %881 = vmatpush3.bf16.msra.mxu1 %v937_v15 }
 0x18d   :  { %882 = vmatprep.subr.bf16.mxu1 %v938_v38 }
 0x190   :  { %883 = vmatpush3.bf16.msra.mxu1 %v938_v38 }
 0x191   :  { %884 = vmatprep.subr.bf16.mxu1 %v939_v16 }
 0x194   :  { %885 = vmatpush3.bf16.msra.mxu1 %v939_v16 }
 0x197   :  { %887 = vmatmul.mubr.bf16.vlgmr.msra.gmra.mxu1 %v452_v49 }
 0x237   :  { %v848_v4 = vpop.f32.mrf.mxu1 }
 0x239   :  { %v849_v17 = vpop.f32.mrf.mxu1 }
 0x23a   :  { %v850_v24 = vadd.f32 %v849_v17, %v848_v4 }
 0x23b   :  { %v851_v18 = vpop.f32.mrf.mxu1 }
 0x23c   :  { %v687_v31 = vadd.f32 %v850_v24, %v807_v25 }
 0x23d   :  { %v852_v19 = vpop.f32.mrf.mxu1 }
 0x23e   :  { %v853_v29 = vadd.f32 %v852_v19, %v851_v18 }
 0x23f   :  { %v854_v1 = vpop.f32.mrf.mxu1 }
 0x240   :  { %v690_v37 = vadd.f32 %v853_v29, %v807_v25 }
 0x241   :  { %v855_v20 = vpop.f32.mrf.mxu1 }
 0x242   :  { %v856_v22 = vadd.f32 %v855_v20, %v854_v1 }
 0x243   :  { %v857_v21 = vpop.f32.mrf.mxu1 }
 0x244   :  { %v695_v28 = vadd.f32 %v856_v22, %v807_v25 }
 0x245   :  { %v858_v23 = vpop.f32.mrf.mxu1 }
 0x246   :  { %v859_v27 = vadd.f32 %v858_v23, %v857_v21 }
 0x248   :  { %v698_v35 = vadd.f32 %v859_v27, %v807_v25 }
 0x257   :  { %v888_v61 = vpop.f32.mrf.mxu1 }
 0x258   :  { %v744_v30 = vadd.f32 %v888_v61, %v695_v28 }
 0x259   :  { %v735_v32 = vpop.f32.mrf.mxu1 }
 0x25a   :  { %vm752_vm0 = vcmp.gt.f32.partialorder %v744_v30, 0.0  ;;  %v756_v33 = vmul.f32 0.01, %v744_v30  ;;  %v736_v34 = vadd.f32 %v735_v32, %v687_v31 }
 0x25b   :  { %v889_v36 = vpop.f32.mrf.mxu1 }
 0x25c   :  { %v760_v39 = vsel %vm752_vm0, %v744_v30, %v756_v33  ;;  %vm750_vm5 = vcmp.gt.f32.partialorder %v736_v34, 0.0  ;;  %v754_v40 = vmul.f32 0.01, %v736_v34  ;;  %v747_v41 = vadd.f32 %v889_v36, %v698_v35 }
 0x25d   :  { %764 = vst [vmem:[#allocation8 + $0x10] sm:$0xff] %v760_v39  ;;  %v738_v42 = vpop.f32.mrf.mxu1 }
 0x25e   :  { %v758_v43 = vsel %vm750_vm5, %v736_v34, %v754_v40  ;;  %vm753_vm9 = vcmp.gt.f32.partialorder %v747_v41, 0.0  ;;  %v757_v44 = vmul.f32 0.01, %v747_v41  ;;  %v739_v45 = vadd.f32 %v738_v42, %v690_v37 }
 0x25f   :  { %762 = vst [vmem:[#allocation8] sm:$0xff] %v758_v43 }
 0x260   :  { %v761_v46 = vsel %vm753_vm9, %v747_v41, %v757_v44  ;;  %vm751_vm12 = vcmp.gt.f32.partialorder %v739_v45, 0.0  ;;  %v755_v47 = vmul.f32 0.01, %v739_v45 }
 0x261   :  { %765 = vst [vmem:[#allocation8 + $0x18] sm:$0xff] %v761_v46 }
 0x262   :  { %v759_v48 = vsel %vm751_vm12, %v739_v45, %v755_v47 }
 0x263   :  { %763 = vst [vmem:[#allocation8 + $0x8] sm:$0xff] %v759_v48 }
 0x264   :  { %1011 = shalt.err (!%p1008_p5)
}
 0x265   :  { %s1034_s12 = smov 128   ;;  %s1035_s13 = smov 8  }
 0x266   :  { %777 = dma.vmem_to_hbm [thread:$0]  %s772_s10, 512, %s1202_s5, [#allocation4], %s1034_s12, %s1034_s12, %s1035_s13  }
 0x267   :  { %1024 = dma.done.wait [#allocation4], 512  }
 0x268   :  { %1025 = vsyncadd [#allocation4], 4294966784 }
 0x269   :  { %781 = vsyncpa [#allocation3], 1 }
 0x26a   :  { %782 = vsyncpa [#allocation6], 1 }
 0x26b   :  { %783 = vsyncpa [#allocation4], 1 }

</bundles_post_ra>
